<compile_context>
chip_gen: v5e
topology: v5e:2x2
jax: 0.10.0
libtpu: 0.0.40
codegen_flags: <defaults>
</compile_context>

<pallas_src>
import functools
import math

import jax
import jax.numpy as jnp
from jax.experimental import pallas as pl
from jax.experimental.pallas import tpu as pltpu


def _round_up(x, m):
    return ((x + m - 1) // m) * m


def _cdiv(a, b):
    return -(-a // b)


def _ae_kernel(x_ref, *rest, n_enc, relu_flags):
    """Fused encoder+decoder forward for one feature-major batch tile.

    rest = (W_0..W_{L-1}, b_0..b_{L-1}, enc_out, dec_out), L = len(relu_flags).
    Activations are (features, TB) with the batch tile on lanes, so every matmul is
    W(out,in) @ h(in,TB) and every store is lane-dense.
    """
    n_lin = len(relu_flags)
    w_refs = rest[:n_lin]
    b_refs = rest[n_lin:2 * n_lin]
    enc_ref = rest[2 * n_lin]
    dec_ref = rest[2 * n_lin + 1]

    h = x_ref[...]                      # (in_dim, TB) in the MXU dtype (bf16 or f32)
    mxu_dtype = h.dtype
    y = None
    for i in range(n_lin):
        w = w_refs[i][...]              # (out_i, in_i), same dtype as h (pre-cast in wrapper)
        b = b_refs[i][...]              # (out_i, 1), f32
        y = jnp.dot(w, h, preferred_element_type=jnp.float32) + b   # f32 accumulate
        if relu_flags[i]:
            y = jnp.maximum(y, 0.0)
        # Dropout(p=0.1) is identity in eval mode -> nothing to do.
        if i == n_enc - 1:
            enc_ref[...] = y.astype(enc_ref.dtype)   # encoder output (no ReLU on this layer)
        if i + 1 < n_lin:
            h = y.astype(mxu_dtype)     # bf16 back to the MXU for the next layer
    dec_ref[...] = y.astype(dec_ref.dtype)


def _vmem_physical_bytes():
    try:
        info = pltpu.get_tpu_info()
        cap = getattr(info, "vmem_capacity_bytes", None)
        if cap:
            return int(cap)
    except Exception:
        pass
    return 64 << 20   # conservative default (v7x per-TensorCore VMEM)


def autoencoder_shrink_forward(
    x, weights, biases, n_enc, relu_flags, enc_dim, out_dim,
    *, block_batch=4096, io_dtype=jnp.bfloat16,
):
    """Returns (encoded, decoded) matching AutoencoderShrink.forward in eval mode.

    weights[i]: (out_i, in_i) PyTorch-native orientation; biases[i]: (out_i, 1).
    Returned arrays are io_dtype (bf16 by default halves HBM traffic; pass
    io_dtype=jnp.float32 for full precision end to end).
    """
    B, in_dim = x.shape
    mxu_dtype = jnp.dtype(io_dtype)

    # --- batch tiling: batch lives on lanes, so everything is a multiple of 128 -------
    bp128 = _round_up(B, 128)
    tb_req = max(128, (int(block_batch) // 128) * 128)
    grid_n = _cdiv(bp128, tb_req)
    if bp128 >= 256:
        grid_n = max(grid_n, 2)        # keep >=2 steps so v7x megacore gets both TCs
    tb = _round_up(_cdiv(bp128, grid_n), 128)   # balanced tiles, minimal padding waste
    bp = grid_n * tb

    # --- feature-major input (cast + transpose + pad fuse into one XLA copy) ----------
    x_t = x.astype(mxu_dtype).T                      # (in_dim, B)
    if bp != B:
        x_t = jnp.pad(x_t, ((0, 0), (0, bp - B)))    # padded lanes sliced off at the end

    # Pre-cast weights ONCE (bf16 operands straight to the MXU); biases stay f32.
    w_mxu = [w.astype(mxu_dtype) for w in weights]
    b_f32 = [b.astype(jnp.float32) for b in biases]

    kernel = functools.partial(_ae_kernel, n_enc=n_enc, relu_flags=tuple(relu_flags))

    # x / outputs move with the batch grid index; params are pinned at block (0, 0) so
    # Pallas keeps them VMEM-resident across grid steps.
    in_specs = [pl.BlockSpec((in_dim, tb), lambda i: (0, i))]
    in_specs += [pl.BlockSpec(w.shape, lambda i: (0, 0)) for w in w_mxu]
    in_specs += [pl.BlockSpec(b.shape, lambda i: (0, 0)) for b in b_f32]
    out_specs = (pl.BlockSpec((enc_dim, tb), lambda i: (0, i)),
                 pl.BlockSpec((out_dim, tb), lambda i: (0, i)))
    out_shape = (jax.ShapeDtypeStruct((enc_dim, bp), io_dtype),
                 jax.ShapeDtypeStruct((out_dim, bp), io_dtype))

    # --- cost estimate & VMEM budget ---------------------------------------------------
    io_itemsize = jnp.dtype(io_dtype).itemsize
    mxu_itemsize = jnp.dtype(mxu_dtype).itemsize
    param_bytes = (sum(int(w.size) for w in weights) * mxu_itemsize
                   + sum(int(b.size) for b in biases) * 4)
    act_bytes = bp * (in_dim * mxu_itemsize + (enc_dim + out_dim) * io_itemsize)
    flops = 2 * bp * sum(int(w.shape[0]) * int(w.shape[1]) for w in weights)
    cost = pl.CostEstimate(flops=flops, transcendentals=0,
                           bytes_accessed=act_bytes + param_bytes)

    max_feat = max(max(int(w.shape[0]), int(w.shape[1])) for w in weights)
    tile_io_bytes = tb * (in_dim * mxu_itemsize + (enc_dim + out_dim) * io_itemsize)
    interm_bytes = 4 * max_feat * tb * 4     # a few live f32 (width, TB) temporaries
    vmem_need = 2 * tile_io_bytes + 2 * param_bytes + interm_bytes + (1 << 20)
    phys = _vmem_physical_bytes()
    vmem_cap = max(16 << 20, min(phys - (24 << 20), int(0.75 * phys)))  # ~40MiB v7x, ~96MiB v5e/v6e
    vmem_limit = int(min(max(2 * vmem_need, 16 << 20), vmem_cap))

    enc_t, dec_t = pl.pallas_call(
        kernel,
        grid=(grid_n,),
        in_specs=in_specs,
        out_specs=out_specs,
        out_shape=out_shape,
        compiler_params=pltpu.CompilerParams(
            dimension_semantics=("parallel",),   # independent batch tiles -> megacore
            vmem_limit_bytes=vmem_limit,
        ),
        cost_estimate=cost,
    )(x_t, *w_mxu, *b_f32)

    # slice + transpose fuse into one small copy each (outputs are only 8..in_dim wide).
    encoded = enc_t[:, :B].T
    decoded = dec_t[:, :B].T
    return encoded, decoded


def _init_linear(key, fan_in, fan_out):
    # Matches PyTorch nn.Linear default init: U(-1/sqrt(fan_in), 1/sqrt(fan_in)).
    kw, kb = jax.random.split(key)
    bound = 1.0 / math.sqrt(fan_in)
    W = jax.random.uniform(kw, (fan_out, fan_in), jnp.float32, -bound, bound)   # (out, in)
    b = jax.random.uniform(kb, (fan_out, 1), jnp.float32, -bound, bound)        # (out, 1)
    return W, b


def build_params(key, input_dim, ae_encoding_dim, hidden_layers, hidden_dim=20):
    enc_dims = [(input_dim, hidden_dim)] + [(hidden_dim, hidden_dim)] * hidden_layers \
               + [(hidden_dim, ae_encoding_dim)]
    enc_relu = [True] * (1 + hidden_layers) + [False]
    dec_dims = [(ae_encoding_dim, hidden_dim)] + [(hidden_dim, hidden_dim)] * hidden_layers \
               + [(hidden_dim, input_dim)]
    dec_relu = [True] * (1 + hidden_layers) + [False]

    dims = enc_dims + dec_dims
    relu_flags = enc_relu + dec_relu
    keys = jax.random.split(key, len(dims))
    weights, biases = [], []
    for k, (fi, fo) in zip(keys, dims):
        W, b = _init_linear(k, fi, fo)
        weights.append(W)
        biases.append(b)
    return weights, biases, relu_flags, len(enc_dims)


def reference_forward(x, weights, biases, n_enc, relu_flags):
    # Pure-JAX f32 reference of the same eval-mode forward (batch-major).
    h = x.astype(jnp.float32)
    encoded = None
    for i, (W, b, r) in enumerate(zip(weights, biases, relu_flags)):
        h = h @ W.T + b[:, 0]
        if r:
            h = jnp.maximum(h, 0.0)
        if i == n_enc - 1:
            encoded = h
    return encoded, h


def reference_forward_bf16(x, weights, biases, n_enc, relu_flags):
    # Mimics the bf16 kernel path: bf16 operands into each matmul, f32 accumulation,
    # f32 bias/ReLU, bf16 re-cast of activations between layers.
    q = lambda a: a.astype(jnp.bfloat16).astype(jnp.float32)
    h = q(x)
    encoded = None
    n = len(weights)
    for i, (W, b, r) in enumerate(zip(weights, biases, relu_flags)):
        y = h @ q(W).T + b[:, 0]
        if r:
            y = jnp.maximum(y, 0.0)
        if i == n_enc - 1:
            encoded = y
        h = q(y) if i + 1 < n else y
    return encoded, h


if __name__ == "__main__":
    # Small config consistent with AutoencoderShrink(input_dim, ae_encoding_dim, hidden_layers).
    input_dim = 32
    ae_encoding_dim = 8
    hidden_layers = 2
    batch = 300          # non-multiple of 128 -> exercises lane padding and a multi-step grid
    block_batch = 128    # small tile for the test (production default is 4096)

    root = jax.random.PRNGKey(0)
    kx, kp = jax.random.split(root)
    x = jax.random.normal(kx, (batch, input_dim), jnp.float32)

    weights, biases, relu_flags, n_enc = build_params(
        kp, input_dim, ae_encoding_dim, hidden_layers, hidden_dim=20
    )

    # --- f32 I/O path ------------------------------------------------------------------
    enc_f32, dec_f32 = autoencoder_shrink_forward(
        x, weights, biases, n_enc, relu_flags, ae_encoding_dim, input_dim,
        block_batch=block_batch, io_dtype=jnp.float32,
    )
    jax.block_until_ready((enc_f32, dec_f32))

    ref_enc, ref_dec = reference_forward(x, weights, biases, n_enc, relu_flags)
    assert enc_f32.shape == (batch, ae_encoding_dim)
    assert dec_f32.shape == (batch, input_dim)
    # Tolerance allows for MXU f32 matmuls using reduced-precision passes on some gens.
    assert jnp.allclose(enc_f32, ref_enc, atol=2e-2, rtol=2e-2)
    assert jnp.allclose(dec_f32, ref_dec, atol=2e-2, rtol=2e-2)

    # --- bf16 I/O path (default; halves HBM activation traffic, f32 accumulation) -------
    enc_bf, dec_bf = autoencoder_shrink_forward(
        x, weights, biases, n_enc, relu_flags, ae_encoding_dim, input_dim,
        block_batch=block_batch, io_dtype=jnp.bfloat16,
    )
    jax.block_until_ready((enc_bf, dec_bf))

    ref_enc_q, ref_dec_q = reference_forward_bf16(x, weights, biases, n_enc, relu_flags)
    assert enc_bf.shape == (batch, ae_encoding_dim)
    assert dec_bf.shape == (batch, input_dim)
    assert jnp.allclose(enc_bf.astype(jnp.float32), ref_enc_q, atol=3e-2, rtol=3e-2)
    assert jnp.allclose(dec_bf.astype(jnp.float32), ref_dec_q, atol=3e-2, rtol=3e-2)

    print("KERNEL_OK")
</pallas_src>

<mosaic_0001>
module attributes {stable_mosaic.version = 11 : i64} {
  func.func @_ae_kernel(%arg0: i32, %arg1: memref<32x128xf32, #tpu.memory_space<vmem>>, %arg2: memref<20x32xf32, #tpu.memory_space<vmem>>, %arg3: memref<20x20xf32, #tpu.memory_space<vmem>>, %arg4: memref<20x20xf32, #tpu.memory_space<vmem>>, %arg5: memref<8x20xf32, #tpu.memory_space<vmem>>, %arg6: memref<20x8xf32, #tpu.memory_space<vmem>>, %arg7: memref<20x20xf32, #tpu.memory_space<vmem>>, %arg8: memref<20x20xf32, #tpu.memory_space<vmem>>, %arg9: memref<32x20xf32, #tpu.memory_space<vmem>>, %arg10: memref<20x1xf32, #tpu.memory_space<vmem>>, %arg11: memref<20x1xf32, #tpu.memory_space<vmem>>, %arg12: memref<20x1xf32, #tpu.memory_space<vmem>>, %arg13: memref<8x1xf32, #tpu.memory_space<vmem>>, %arg14: memref<20x1xf32, #tpu.memory_space<vmem>>, %arg15: memref<20x1xf32, #tpu.memory_space<vmem>>, %arg16: memref<20x1xf32, #tpu.memory_space<vmem>>, %arg17: memref<32x1xf32, #tpu.memory_space<vmem>>, %arg18: memref<8x128xf32, #tpu.memory_space<vmem>>, %arg19: memref<32x128xf32, #tpu.memory_space<vmem>>) attributes {dimension_semantics = [#tpu.dimension_semantics<parallel>], iteration_bounds = array<i64: 3>, scalar_prefetch = 0 : i64, scratch_operands = 0 : i64, tpu.core_type = #tpu.core_type<tc>, window_params = [{transform_indices = @transform_0, window_bounds = array<i64: 32, 128>}, {pipeline_mode = #tpu.pipeline_mode<synchronous>, transform_indices = @transform_1, window_bounds = array<i64: 20, 32>}, {pipeline_mode = #tpu.pipeline_mode<synchronous>, transform_indices = @transform_2, window_bounds = array<i64: 20, 20>}, {pipeline_mode = #tpu.pipeline_mode<synchronous>, transform_indices = @transform_3, window_bounds = array<i64: 20, 20>}, {pipeline_mode = #tpu.pipeline_mode<synchronous>, transform_indices = @transform_4, window_bounds = array<i64: 8, 20>}, {pipeline_mode = #tpu.pipeline_mode<synchronous>, transform_indices = @transform_5, window_bounds = array<i64: 20, 8>}, {pipeline_mode = #tpu.pipeline_mode<synchronous>, transform_indices = @transform_6, window_bounds = array<i64: 20, 20>}, {pipeline_mode = #tpu.pipeline_mode<synchronous>, transform_indices = @transform_7, window_bounds = array<i64: 20, 20>}, {pipeline_mode = #tpu.pipeline_mode<synchronous>, transform_indices = @transform_8, window_bounds = array<i64: 32, 20>}, {pipeline_mode = #tpu.pipeline_mode<synchronous>, transform_indices = @transform_9, window_bounds = array<i64: 20, 1>}, {pipeline_mode = #tpu.pipeline_mode<synchronous>, transform_indices = @transform_10, window_bounds = array<i64: 20, 1>}, {pipeline_mode = #tpu.pipeline_mode<synchronous>, transform_indices = @transform_11, window_bounds = array<i64: 20, 1>}, {pipeline_mode = #tpu.pipeline_mode<synchronous>, transform_indices = @transform_12, window_bounds = array<i64: 8, 1>}, {pipeline_mode = #tpu.pipeline_mode<synchronous>, transform_indices = @transform_13, window_bounds = array<i64: 20, 1>}, {pipeline_mode = #tpu.pipeline_mode<synchronous>, transform_indices = @transform_14, window_bounds = array<i64: 20, 1>}, {pipeline_mode = #tpu.pipeline_mode<synchronous>, transform_indices = @transform_15, window_bounds = array<i64: 20, 1>}, {pipeline_mode = #tpu.pipeline_mode<synchronous>, transform_indices = @transform_16, window_bounds = array<i64: 32, 1>}, {transform_indices = @transform_17, window_bounds = array<i64: 8, 128>}, {transform_indices = @transform_18, window_bounds = array<i64: 32, 128>}]} {
    %c0 = arith.constant 0 : index
    %c0_0 = arith.constant 0 : index
    %0 = vector.load %arg1[%c0, %c0_0] : memref<32x128xf32, #tpu.memory_space<vmem>>, vector<32x128xf32>
    %c0_1 = arith.constant 0 : index
    %c0_2 = arith.constant 0 : index
    %1 = vector.load %arg2[%c0_1, %c0_2] : memref<20x32xf32, #tpu.memory_space<vmem>>, vector<20x32xf32>
    %c0_3 = arith.constant 0 : index
    %c0_4 = arith.constant 0 : index
    %2 = vector.load %arg10[%c0_3, %c0_4] : memref<20x1xf32, #tpu.memory_space<vmem>>, vector<20x1xf32>
    %cst = arith.constant dense<0.000000e+00> : vector<20x128xf32>
    %3 = tpu.matmul %1, %0, %cst {dimension_numbers = #tpu.dot_dimension_numbers<[1], [0], [0], [1], [0, 0, 1, 1], [], []>} : vector<20x32xf32>, vector<32x128xf32>, vector<20x128xf32> -> vector<20x128xf32>
    %4 = vector.broadcast %2 : vector<20x1xf32> to vector<20x128xf32>
    %5 = arith.addf %3, %4 : vector<20x128xf32>
    %cst_5 = arith.constant 0.000000e+00 : f32
    %6 = vector.broadcast %cst_5 : f32 to vector<20x128xf32>
    %7 = arith.maximumf %5, %6 : vector<20x128xf32>
    %c0_6 = arith.constant 0 : index
    %c0_7 = arith.constant 0 : index
    %8 = vector.load %arg3[%c0_6, %c0_7] : memref<20x20xf32, #tpu.memory_space<vmem>>, vector<20x20xf32>
    %c0_8 = arith.constant 0 : index
    %c0_9 = arith.constant 0 : index
    %9 = vector.load %arg11[%c0_8, %c0_9] : memref<20x1xf32, #tpu.memory_space<vmem>>, vector<20x1xf32>
    %cst_10 = arith.constant dense<0.000000e+00> : vector<20x128xf32>
    %10 = tpu.matmul %8, %7, %cst_10 {dimension_numbers = #tpu.dot_dimension_numbers<[1], [0], [0], [1], [0, 0, 1, 1], [], []>} : vector<20x20xf32>, vector<20x128xf32>, vector<20x128xf32> -> vector<20x128xf32>
    %11 = vector.broadcast %9 : vector<20x1xf32> to vector<20x128xf32>
    %12 = arith.addf %10, %11 : vector<20x128xf32>
    %cst_11 = arith.constant 0.000000e+00 : f32
    %13 = vector.broadcast %cst_11 : f32 to vector<20x128xf32>
    %14 = arith.maximumf %12, %13 : vector<20x128xf32>
    %c0_12 = arith.constant 0 : index
    %c0_13 = arith.constant 0 : index
    %15 = vector.load %arg4[%c0_12, %c0_13] : memref<20x20xf32, #tpu.memory_space<vmem>>, vector<20x20xf32>
    %c0_14 = arith.constant 0 : index
    %c0_15 = arith.constant 0 : index
    %16 = vector.load %arg12[%c0_14, %c0_15] : memref<20x1xf32, #tpu.memory_space<vmem>>, vector<20x1xf32>
    %cst_16 = arith.constant dense<0.000000e+00> : vector<20x128xf32>
    %17 = tpu.matmul %15, %14, %cst_16 {dimension_numbers = #tpu.dot_dimension_numbers<[1], [0], [0], [1], [0, 0, 1, 1], [], []>} : vector<20x20xf32>, vector<20x128xf32>, vector<20x128xf32> -> vector<20x128xf32>
    %18 = vector.broadcast %16 : vector<20x1xf32> to vector<20x128xf32>
    %19 = arith.addf %17, %18 : vector<20x128xf32>
    %cst_17 = arith.constant 0.000000e+00 : f32
    %20 = vector.broadcast %cst_17 : f32 to vector<20x128xf32>
    %21 = arith.maximumf %19, %20 : vector<20x128xf32>
    %c0_18 = arith.constant 0 : index
    %c0_19 = arith.constant 0 : index
    %22 = vector.load %arg5[%c0_18, %c0_19] : memref<8x20xf32, #tpu.memory_space<vmem>>, vector<8x20xf32>
    %c0_20 = arith.constant 0 : index
    %c0_21 = arith.constant 0 : index
    %23 = vector.load %arg13[%c0_20, %c0_21] : memref<8x1xf32, #tpu.memory_space<vmem>>, vector<8x1xf32>
    %cst_22 = arith.constant dense<0.000000e+00> : vector<8x128xf32>
    %24 = tpu.matmul %22, %21, %cst_22 {dimension_numbers = #tpu.dot_dimension_numbers<[1], [0], [0], [1], [0, 0, 1, 1], [], []>} : vector<8x20xf32>, vector<20x128xf32>, vector<8x128xf32> -> vector<8x128xf32>
    %25 = vector.broadcast %23 : vector<8x1xf32> to vector<8x128xf32>
    %26 = arith.addf %24, %25 : vector<8x128xf32>
    %c0_23 = arith.constant 0 : index
    %c0_24 = arith.constant 0 : index
    %27 = vector.load %arg18[%c0_23, %c0_24] : memref<8x128xf32, #tpu.memory_space<vmem>>, vector<8x128xf32>
    tpu.vector_store %arg18[%c0_23, %c0_24], %26 {strides = array<i32>} : memref<8x128xf32, #tpu.memory_space<vmem>>, vector<8x128xf32>,
    %c0_25 = arith.constant 0 : index
    %c0_26 = arith.constant 0 : index
    %28 = vector.load %arg6[%c0_25, %c0_26] : memref<20x8xf32, #tpu.memory_space<vmem>>, vector<20x8xf32>
    %c0_27 = arith.constant 0 : index
    %c0_28 = arith.constant 0 : index
    %29 = vector.load %arg14[%c0_27, %c0_28] : memref<20x1xf32, #tpu.memory_space<vmem>>, vector<20x1xf32>
    %cst_29 = arith.constant dense<0.000000e+00> : vector<20x128xf32>
    %30 = tpu.matmul %28, %26, %cst_29 {dimension_numbers = #tpu.dot_dimension_numbers<[1], [0], [0], [1], [0, 0, 1, 1], [], []>} : vector<20x8xf32>, vector<8x128xf32>, vector<20x128xf32> -> vector<20x128xf32>
    %31 = vector.broadcast %29 : vector<20x1xf32> to vector<20x128xf32>
    %32 = arith.addf %30, %31 : vector<20x128xf32>
    %cst_30 = arith.constant 0.000000e+00 : f32
    %33 = vector.broadcast %cst_30 : f32 to vector<20x128xf32>
    %34 = arith.maximumf %32, %33 : vector<20x128xf32>
    %c0_31 = arith.constant 0 : index
    %c0_32 = arith.constant 0 : index
    %35 = vector.load %arg7[%c0_31, %c0_32] : memref<20x20xf32, #tpu.memory_space<vmem>>, vector<20x20xf32>
    %c0_33 = arith.constant 0 : index
    %c0_34 = arith.constant 0 : index
    %36 = vector.load %arg15[%c0_33, %c0_34] : memref<20x1xf32, #tpu.memory_space<vmem>>, vector<20x1xf32>
    %cst_35 = arith.constant dense<0.000000e+00> : vector<20x128xf32>
    %37 = tpu.matmul %35, %34, %cst_35 {dimension_numbers = #tpu.dot_dimension_numbers<[1], [0], [0], [1], [0, 0, 1, 1], [], []>} : vector<20x20xf32>, vector<20x128xf32>, vector<20x128xf32> -> vector<20x128xf32>
    %38 = vector.broadcast %36 : vector<20x1xf32> to vector<20x128xf32>
    %39 = arith.addf %37, %38 : vector<20x128xf32>
    %cst_36 = arith.constant 0.000000e+00 : f32
    %40 = vector.broadcast %cst_36 : f32 to vector<20x128xf32>
    %41 = arith.maximumf %39, %40 : vector<20x128xf32>
    %c0_37 = arith.constant 0 : index
    %c0_38 = arith.constant 0 : index
    %42 = vector.load %arg8[%c0_37, %c0_38] : memref<20x20xf32, #tpu.memory_space<vmem>>, vector<20x20xf32>
    %c0_39 = arith.constant 0 : index
    %c0_40 = arith.constant 0 : index
    %43 = vector.load %arg16[%c0_39, %c0_40] : memref<20x1xf32, #tpu.memory_space<vmem>>, vector<20x1xf32>
    %cst_41 = arith.constant dense<0.000000e+00> : vector<20x128xf32>
    %44 = tpu.matmul %42, %41, %cst_41 {dimension_numbers = #tpu.dot_dimension_numbers<[1], [0], [0], [1], [0, 0, 1, 1], [], []>} : vector<20x20xf32>, vector<20x128xf32>, vector<20x128xf32> -> vector<20x128xf32>
    %45 = vector.broadcast %43 : vector<20x1xf32> to vector<20x128xf32>
    %46 = arith.addf %44, %45 : vector<20x128xf32>
    %cst_42 = arith.constant 0.000000e+00 : f32
    %47 = vector.broadcast %cst_42 : f32 to vector<20x128xf32>
    %48 = arith.maximumf %46, %47 : vector<20x128xf32>
    %c0_43 = arith.constant 0 : index
    %c0_44 = arith.constant 0 : index
    %49 = vector.load %arg9[%c0_43, %c0_44] : memref<32x20xf32, #tpu.memory_space<vmem>>, vector<32x20xf32>
    %c0_45 = arith.constant 0 : index
    %c0_46 = arith.constant 0 : index
    %50 = vector.load %arg17[%c0_45, %c0_46] : memref<32x1xf32, #tpu.memory_space<vmem>>, vector<32x1xf32>
    %cst_47 = arith.constant dense<0.000000e+00> : vector<32x128xf32>
    %51 = tpu.matmul %49, %48, %cst_47 {dimension_numbers = #tpu.dot_dimension_numbers<[1], [0], [0], [1], [0, 0, 1, 1], [], []>} : vector<32x20xf32>, vector<20x128xf32>, vector<32x128xf32> -> vector<32x128xf32>
    %52 = vector.broadcast %50 : vector<32x1xf32> to vector<32x128xf32>
    %53 = arith.addf %51, %52 : vector<32x128xf32>
    %c0_48 = arith.constant 0 : index
    %c0_49 = arith.constant 0 : index
    %54 = vector.load %arg19[%c0_48, %c0_49] : memref<32x128xf32, #tpu.memory_space<vmem>>, vector<32x128xf32>
    tpu.vector_store %arg19[%c0_48, %c0_49], %53 {strides = array<i32>} : memref<32x128xf32, #tpu.memory_space<vmem>>, vector<32x128xf32>,
    return
  }
  func.func @transform_0(%arg0: i32) -> (i32, i32) {
    %c0_i32 = arith.constant 0 : i32
    %c0_i32_0 = arith.constant 0 : i32
    return %c0_i32, %arg0 : i32, i32
  }
  func.func @transform_1(%arg0: i32) -> (i32, i32) {
    %c0_i32 = arith.constant 0 : i32
    %c0_i32_0 = arith.constant 0 : i32
    %c0_i32_1 = arith.constant 0 : i32
    return %c0_i32, %c0_i32_0 : i32, i32
  }
  func.func @transform_2(%arg0: i32) -> (i32, i32) {
    %c0_i32 = arith.constant 0 : i32
    %c0_i32_0 = arith.constant 0 : i32
    %c0_i32_1 = arith.constant 0 : i32
    return %c0_i32, %c0_i32_0 : i32, i32
  }
  func.func @transform_3(%arg0: i32) -> (i32, i32) {
    %c0_i32 = arith.constant 0 : i32
    %c0_i32_0 = arith.constant 0 : i32
    %c0_i32_1 = arith.constant 0 : i32
    return %c0_i32, %c0_i32_0 : i32, i32
  }
  func.func @transform_4(%arg0: i32) -> (i32, i32) {
    %c0_i32 = arith.constant 0 : i32
    %c0_i32_0 = arith.constant 0 : i32
    %c0_i32_1 = arith.constant 0 : i32
    return %c0_i32, %c0_i32_0 : i32, i32
  }
  func.func @transform_5(%arg0: i32) -> (i32, i32) {
    %c0_i32 = arith.constant 0 : i32
    %c0_i32_0 = arith.constant 0 : i32
    %c0_i32_1 = arith.constant 0 : i32
    return %c0_i32, %c0_i32_0 : i32, i32
  }
  func.func @transform_6(%arg0: i32) -> (i32, i32) {
    %c0_i32 = arith.constant 0 : i32
    %c0_i32_0 = arith.constant 0 : i32
    %c0_i32_1 = arith.constant 0 : i32
    return %c0_i32, %c0_i32_0 : i32, i32
  }
  func.func @transform_7(%arg0: i32) -> (i32, i32) {
    %c0_i32 = arith.constant 0 : i32
    %c0_i32_0 = arith.constant 0 : i32
    %c0_i32_1 = arith.constant 0 : i32
    return %c0_i32, %c0_i32_0 : i32, i32
  }
  func.func @transform_8(%arg0: i32) -> (i32, i32) {
    %c0_i32 = arith.constant 0 : i32
    %c0_i32_0 = arith.constant 0 : i32
    %c0_i32_1 = arith.constant 0 : i32
    return %c0_i32, %c0_i32_0 : i32, i32
  }
  func.func @transform_9(%arg0: i32) -> (i32, i32) {
    %c0_i32 = arith.constant 0 : i32
    %c0_i32_0 = arith.constant 0 : i32
    %c0_i32_1 = arith.constant 0 : i32
    return %c0_i32, %c0_i32_0 : i32, i32
  }
  func.func @transform_10(%arg0: i32) -> (i32, i32) {
    %c0_i32 = arith.constant 0 : i32
    %c0_i32_0 = arith.constant 0 : i32
    %c0_i32_1 = arith.constant 0 : i32
    return %c0_i32, %c0_i32_0 : i32, i32
  }
  func.func @transform_11(%arg0: i32) -> (i32, i32) {
    %c0_i32 = arith.constant 0 : i32
    %c0_i32_0 = arith.constant 0 : i32
    %c0_i32_1 = arith.constant 0 : i32
    return %c0_i32, %c0_i32_0 : i32, i32
  }
  func.func @transform_12(%arg0: i32) -> (i32, i32) {
    %c0_i32 = arith.constant 0 : i32
    %c0_i32_0 = arith.constant 0 : i32
    %c0_i32_1 = arith.constant 0 : i32
    return %c0_i32, %c0_i32_0 : i32, i32
  }
  func.func @transform_13(%arg0: i32) -> (i32, i32) {
    %c0_i32 = arith.constant 0 : i32
    %c0_i32_0 = arith.constant 0 : i32
    %c0_i32_1 = arith.constant 0 : i32
    return %c0_i32, %c0_i32_0 : i32, i32
  }
  func.func @transform_14(%arg0: i32) -> (i32, i32) {
    %c0_i32 = arith.constant 0 : i32
    %c0_i32_0 = arith.constant 0 : i32
    %c0_i32_1 = arith.constant 0 : i32
    return %c0_i32, %c0_i32_0 : i32, i32
  }
  func.func @transform_15(%arg0: i32) -> (i32, i32) {
    %c0_i32 = arith.constant 0 : i32
    %c0_i32_0 = arith.constant 0 : i32
    %c0_i32_1 = arith.constant 0 : i32
    return %c0_i32, %c0_i32_0 : i32, i32
  }
  func.func @transform_16(%arg0: i32) -> (i32, i32) {
    %c0_i32 = arith.constant 0 : i32
    %c0_i32_0 = arith.constant 0 : i32
    %c0_i32_1 = arith.constant 0 : i32
    return %c0_i32, %c0_i32_0 : i32, i32
  }
  func.func @transform_17(%arg0: i32) -> (i32, i32) {
    %c0_i32 = arith.constant 0 : i32
    %c0_i32_0 = arith.constant 0 : i32
    return %c0_i32, %arg0 : i32, i32
  }
  func.func @transform_18(%arg0: i32) -> (i32, i32) {
    %c0_i32 = arith.constant 0 : i32
    %c0_i32_0 = arith.constant 0 : i32
    return %c0_i32, %arg0 : i32, i32
  }
}

</mosaic_0001>

<bundles_post_ra>
// kernel: tpu_custom_call.1
= control target key start
LH: loop header
LB: loop body
LE: loop exit
PB: predicated region body
PF: predicated region fallthrough
CT: control target
= control target key end

     0   :  { %s1824_s0 = inlined_call_operand.vmem [shape: f32[32,384], index: 0, kind: input, shape index: {}]   ;;  %s1825_s1 = inlined_call_operand.vmem [shape: f32[20,32], index: 1, kind: input, shape index: {}]   ;;  %s1826_s2 = inlined_call_operand.vmem [shape: f32[20,20], index: 2, kind: input, shape index: {}]   ;;  %s1827_s3 = inlined_call_operand.vmem [shape: f32[20,20], index: 3, kind: input, shape index: {}]   ;;  %s1828_s4 = inlined_call_operand.vmem [shape: f32[8,20], index: 4, kind: input, shape index: {}]   ;;  %s1829_s5 = inlined_call_operand.vmem [shape: f32[20,8], index: 5, kind: input, shape index: {}]   ;;  %s1830_s6 = inlined_call_operand.vmem [shape: f32[20,20], index: 6, kind: input, shape index: {}]   ;;  %s1831_s7 = inlined_call_operand.vmem [shape: f32[20,20], index: 7, kind: input, shape index: {}]   ;;  %s1832_s8 = inlined_call_operand.vmem [shape: f32[32,20], index: 8, kind: input, shape index: {}]   ;;  %s1833_s9 = inlined_call_operand.vmem [shape: f32[20,1], index: 9, kind: input, shape index: {}]   ;;  %s1834_s10 = inlined_call_operand.vmem [shape: f32[20,1], index: 10, kind: input, shape index: {}]   ;;  %s1835_s11 = inlined_call_operand.vmem [shape: f32[20,1], index: 11, kind: input, shape index: {}]   ;;  %s1836_s12 = inlined_call_operand.vmem [shape: f32[8,1], index: 12, kind: input, shape index: {}]   ;;  %s1837_s13 = inlined_call_operand.vmem [shape: f32[20,1], index: 13, kind: input, shape index: {}]   ;;  %s1838_s14 = inlined_call_operand.vmem [shape: f32[20,1], index: 14, kind: input, shape index: {}]   ;;  %s1839_s15 = inlined_call_operand.vmem [shape: f32[20,1], index: 15, kind: input, shape index: {}]   ;;  %s1840_s16 = inlined_call_operand.vmem [shape: f32[32,1], index: 16, kind: input, shape index: {}]   ;;  %s1841_s17 = inlined_call_operand.hbm [shape: f32[8,384], index: 17, kind: output, shape index: {0}]   ;;  %s1842_s18 = inlined_call_operand.hbm [shape: f32[32,384], index: 18, kind: output, shape index: {1}]  }
   0x1   :  { %1854 = sst [smem:[#allocation14_spill]] %s1824_s0 }
   0x2   :  { %1855 = sst [smem:[#allocation15_spill]] %s1825_s1 }
   0x3   :  { %1856 = sst [smem:[#allocation16_spill]] %s1826_s2 }
   0x4   :  { %1857 = sst [smem:[#allocation17_spill]] %s1827_s3 }
   0x5   :  { %1858 = sst [smem:[#allocation18_spill]] %s1828_s4 }
   0x6   :  { %24 = vsyncpa [#allocation4], 0 }
   0x7   :  { %26 = vsyncpa [#allocation4 + $0x1], 0 }
   0x8   :  { %27 = vsyncpa [#allocation6], 0 }
   0x9   :  { %29 = vsyncpa [#allocation6 + $0x1], 0  ;;  %s1545_s27 = smov 0   ;;  %s1547_s28 = smov 0  }
   0xa   :  { %s1549_s29 = smov 0   ;;  %s1551_s30 = smov 0  }
   0xb LB: > { %1859 = sst [smem:[#allocation9_spill]] %s1436_s28  ;;  %s1845_s0 = sadd.s32 4294967295, %s1444_s30   ;;  %s1444_s30 = sphi %s1551_s30, %s1875_s30   ;;  %s1440_s29 = sphi %s1549_s29, %s1878_s29   ;;  %s1436_s28 = sphi %s1547_s28, %s1877_s28   ;;  %s1432_s27 = sphi %s1545_s27, %s1876_s27  }
   0xc   : > { %1860 = sst [smem:[#allocation10_spill]] %s1440_s29  ;;  %s1251_s19 = sadd.s32 4294967294, %s1444_s30  }
   0xd   : > { %s1568_s1 = sadd.s32 1, %s1444_s30   ;;  %s42_s20 = sadd.s32 1, %s1440_s29 }
   0xe   : > { %1861 = sst [smem:[#allocation11_spill]] %s1568_s1  ;;  %s39_s21 = ssub.s32 %s1444_s30, %s1568_s1 }
   0xf   : > { %p49_p0 = scmp.ne.s32.totalorder %s1440_s29, %s1436_s28  ;;  %p40_p1 = scmp.eq.s32.totalorder %s39_s21, 0 }
  0x10   : > { %p50_p2 = scmp.eq.s32.totalorder %s1444_s30, 0  ;;  %p415_p3 = scmp.eq.s32.totalorder %s1845_s0, 2 }
  0x11   : > { %p420_p4 = scmp.ne.s32.totalorder %s1436_s28, %s1432_s27  ;;  %p421_p7 = scmp.eq.s32.totalorder %s1251_s19, 2 }
  0x12   : > { %s1581_s22 = scalar_select %p40_p1, %s1440_s29, %s42_s20  }
  0x13   : > { %p51_p5 = por %p50_p2, %p49_p0  ;;  %p1583_p6 = por %p415_p3, %p49_p0 }
  0x14   : > { %1862 = sst [smem:[#allocation12_spill]] %s1581_s22  ;;  %p1587_p8 = por %p421_p7, %p420_p4 }
  0x15   : > { %p1253_p9 = scmp.ge.s32.totalorder %s1444_s30, 3 }
  0x16   : > { %s1864_s23 = scalar_select %p1587_p8, 1, 0 }
  0x17   : > { %511 = sbr.rel (%p1253_p9) target bundleno = 42 (0x2a), region = 80 }
  0x18   : > { %1865 = sst [smem:[#allocation13_spill]] %s1864_s23 }
  0x1c   : > { %514 = sbr.rel (!%p51_p5) target bundleno = 42 (0x2a), region = 84  ;;  %s516_s24 = sand.u32 (%p51_p5), 1, %s1440_s29  }
  0x1d   : > { %s1255_s25 = sshll.u32 (%p51_p5), %s1444_s30, 3  ;;  %s1254_s26 = sshll.u32 (%p51_p5), %s516_s24, 5 }
  0x1e   : > { %s1866_s0 = sld [smem:[#allocation14_spill]] (%p51_p5)  ;;  %s518_s19 = scalar_lea.vmem (%p51_p5), [#allocation2], %s1254_s26 }
  0x24   : > { %s520_s22 = scalar_lea.vmem %s1866_s0, %s1255_s25 }
  0x25   : > { %v555_v0 = vld [vmem:[%s520_s22] sm:$0xff]  ;;  %v557_v1 = vld [vmem:[%s520_s22 + $0x18] sm:$0xff]  ;;  %v559_v2 = vld [vmem:[%s520_s22 + $0x30] sm:$0xff] }
  0x26   : > { %556 = vst [vmem:[%s518_s19] sm:$0xff] %v555_v0  ;;  %v561_v3 = vld [vmem:[%s520_s22 + $0x48] sm:$0xff] }
  0x27   : > { %558 = vst [vmem:[%s518_s19 + $0x8] sm:$0xff] %v557_v1 }
  0x28   : > { %560 = vst [vmem:[%s518_s19 + $0x10] sm:$0xff] %v559_v2 }
  0x29   : > { %562 = vst [vmem:[%s518_s19 + $0x18] sm:$0xff] %v561_v3 }
  0x2a PF: > { %p1256_p10 = scmp.ge.s32.totalorder %s1444_s30, 1  ;;  %p567_p11 = scmp.lt.s32.totalorder %s1444_s30, 4 }
  0x2c   : > { %p568_p12 = pnand %p1256_p10, %p567_p11 }
  0x2d   : > { %s1606_s22 = sand.u32 (!%p568_p12), 1, %s1436_s28   ;;  %s1867_s29 = sld [smem:[#allocation15_spill]] (!%p568_p12) }
  0x2e   : > { %571 = sbr.rel (%p568_p12) target bundleno = 1276 (0x4fc), region = 122  ;;  %s1846_s26 = sshll.u32 (!%p568_p12), %s1606_s22, 5 }
  0x2f   : > { %s576_s21 = scalar_lea.vmem (!%p568_p12), [#allocation2], %s1846_s26  ;;  %s1869_s0 = sld [smem:[#allocation16_spill]] (!%p568_p12) }
  0x30   : > { %s1870_s3 = sld [smem:[#allocation17_spill]] (!%p568_p12)  ;;  %s1258_s28 = sshll.u32 (!%p568_p12), %s1606_s22, 3 }
  0x31   : > { %s1871_s4 = sld [smem:[#allocation18_spill]] (!%p568_p12)  ;;  %s1718_s19 = scalar_lea.vmem (!%p568_p12), [#allocation3], %s1258_s28 }
  0x32   : > { %s1872_s24 = sadd.s32 (!%p568_p12), 4294967295, %s1444_s30   ;;  %s1117_s26 = scalar_lea.sflag (!%p568_p12), [#allocation4], %s1606_s22 }
  0x33   : > { %v641_v4 = vld [vmem:[%s1833_s9 + $0x10] sm:$0xf]  ;;  %v639_v5 = vld [vmem:[%s1833_s9] sm:$0xff]  ;;  %v1446_v6 = vmov 0   ;;  %v635_v7 = vld [vmem:[%s576_s21 + $0x18] sm:$0xff]  ;;  %s1868_s1 = smov %s1867_s29  ;;  %vm657_vm0 = vcmask 261120  }
  0x34   : > { %1348 = vset.pattern.permute.xlu1 %v1446_v6  ;;  %1347 = vset.pattern.permute.xlu0 %v1446_v6  ;;  %v634_v8 = vld [vmem:[%s576_s21 + $0x10] sm:$0xff]  ;;  %v633_v9 = vld [vmem:[%s576_s21 + $0x8] sm:$0xff]  ;;  %v632_v12 = vld [vmem:[%s576_s21] sm:$0xff]  ;;  %vm727_vm1 = vcmask 1043456   ;;  %vm717_vm2 = vcmask 162816   ;;  %vm877_vm3 = vcmask 64512  }
  0x35   : > { %654 = vperm.xlu0 %1347, %v641_v4   ;;  %644 = vperm.xlu1 %1348, %v639_v5   ;;  %v640_v10 = vld [vmem:[%s1833_s9 + $0x8] sm:$0xff]  ;;  %v701_v11 = vld [vmem:[%s1834_s10 + $0x10] sm:$0xf]  ;;  %v636_v14 = vld [vmem:[%s1868_s1] sm:$0xff]  ;;  %s1771_s21 = sshll.u32 %s1872_s24, 3  ;;  %s1370_s24 = scalar_lea.hbm %s1841_s17, 24 }
  0x36   : > { %1349 = vset.pattern.permute.xlu2 %v1446_v6  ;;  %1295 = vmatpush.msra.mxu3 %v635_v7  ;;  %v637_v13 = vld [vmem:[%s1867_s29 + $0x8] sm:$0xff]  ;;  %v765_v15 = vld [vmem:[%s1835_s11 + $0x10] sm:$0xf]  ;;  %v823_v18 = vld [vmem:[%s1836_s12] sm:$0xff]  ;;  %s1132_s29 = scalar_lea.hbm %s1841_s17, %s1771_s21 }
  0x37   : > { %679 = vmatpush.msra.mxu0 %v635_v7  ;;  %v764_v16 = vld [vmem:[%s1835_s11 + $0x8] sm:$0xff]  ;;  %v638_v17 = vld [vmem:[%s1868_s1 + $0x10] sm:$0xf]  ;;  %v859_v20 = vld [vmem:[%s1837_s13] sm:$0xff]  ;;  %s1134_s1 = sshll.u32 %s1718_s19, 4  ;;  %s1135_s1 = int_to_ptr.vmem [resolvable:$true] %s1134_s1 }
  0x38   : > { %1296 = vmatpush.msra.mxu3 %v634_v8  ;;  %v861_v19 = vld [vmem:[%s1837_s13 + $0x10] sm:$0xf]  ;;  %v919_v22 = vld [vmem:[%s1838_s14] sm:$0xff]  ;;  %v1047_v27 = vld [vmem:[%s1840_s16 + $0x18] sm:$0xff] }
  0x39   : > { %680 = vmatpush.msra.mxu0 %v634_v8  ;;  %v921_v21 = vld [vmem:[%s1838_s14 + $0x10] sm:$0xf]  ;;  %v981_v24 = vld [vmem:[%s1839_s15] sm:$0xff]  ;;  %v700_v28 = vld [vmem:[%s1834_s10 + $0x8] sm:$0xff] }
  0x3a   : > { %1297 = vmatpush.msra.mxu3 %v633_v9  ;;  %v983_v23 = vld [vmem:[%s1839_s15 + $0x10] sm:$0xf]  ;;  %v1044_v25 = vld [vmem:[%s1840_s16] sm:$0xff]  ;;  %709 = vperm.xlu2 %1349, %v700_v28   ;;  %v860_v33 = vld [vmem:[%s1837_s13 + $0x8] sm:$0xff] }
  0x3b   : > { %681 = vmatpush.msra.mxu0 %v633_v9  ;;  %v1046_v26 = vld [vmem:[%s1840_s16 + $0x10] sm:$0xff]  ;;  %v699_v29 = vld [vmem:[%s1834_s10] sm:$0xff]  ;;  %v920_v44 = vld [vmem:[%s1838_s14 + $0x8] sm:$0xff] }
  0x3c   : > { %1298 = vmatpush.msra.mxu3 %v632_v12  ;;  %v763_v30 = vld [vmem:[%s1835_s11] sm:$0xff]  ;;  %v982_v46 = vld [vmem:[%s1839_s15 + $0x8] sm:$0xff]  ;;  %v698_v49 = vld [vmem:[%s1869_s0 + $0x10] sm:$0xf] }
  0x3d   : > { %649 = vperm.xlu0 %1347, %v640_v10   ;;  %714 = vperm.xlu1 %1348, %v701_v11   ;;  %v696_v45 = vld [vmem:[%s1869_s0] sm:$0xff]  ;;  %v697_v47 = vld [vmem:[%s1869_s0 + $0x8] sm:$0xff]  ;;  %v762_v0 = vld [vmem:[%s1870_s3 + $0x10] sm:$0xf] }
  0x3e   : > { %682 = vmatpush.msra.mxu0 %v632_v12  ;;  %1261 = vmatmul.msk.f32.vlgmr.msra.gmra.mxu3 %vm657_vm0, %v637_v13  ;;  %v1045_v48 = vld [vmem:[%s1840_s16 + $0x8] sm:$0xff]  ;;  %v760_v62 = vld [vmem:[%s1870_s3] sm:$0xff] }
  0x3f   : > { %1260 = vmatmul.msk.f32.vlgmr.msra.gmra.mxu0 %vm657_vm0, %v636_v14  ;;  %v761_v63 = vld [vmem:[%s1870_s3 + $0x8] sm:$0xff]  ;;  %v822_v13 = vld [vmem:[%s1871_s4] sm:$0xff]  ;;  %s1136_s3 = sshll.u32 %s1132_s29, 4  ;;  %s1137_s3 = int_to_ptr.hbm [resolvable:$true] %s1136_s3 }
  0x40   : > { %s1364_s28 = sshra.s32 %s1137_s3, 4  ;;  %s1365_s28 = int_to_ptr.hbm [resolvable:$true] %s1364_s28 }
  0x41   : > { %s1366_s4 = scalar_lea.hbm %s1365_s28, 8  ;;  %p1371_p2 = scmp.lt.s32.totalorder %s1365_s28, %s1841_s17 }
  0x42   : > { %704 = vperm.xlu2 %1349, %v699_v29   ;;  %p1367_p13 = scmp.ne.s32.totalorder %s1365_s28, %s1366_s4  ;;  %p1372_p3 = scmp.lt.s32.totalorder %s1370_s24, %s1366_s4 }
  0x44   : > { %p1368_p0 = pnand %p1367_p13, %p1583_p6  ;;  %p1373_p4 = por %p1372_p3, %p1371_p2 }
  0x45   : > { %778 = vperm.xlu0 %1347, %v765_v15   ;;  %773 = vperm.xlu1 %1348, %v764_v16  }
  0x46   : > { %1262 = vmatmul.msk.f32.gmra.mxu3 %vm657_vm0, %v638_v17  ;;  %v856_v17 = vld [vmem:[%s1829_s5] sm:$0xff]  ;;  %p1369_p1 = pneg %p1368_p0 }
  0x48   : > { %p1374_p5 = pnand %p1373_p4, %p1369_p1 }
  0x4a   : > { %768 = vperm.xlu2 %1349, %v763_v30  }
  0x4d   : > { %826 = vperm.xlu0 %1347, %v823_v18   ;;  %874 = vperm.xlu1 %1348, %v861_v19   ;;  %v857_v18 = vld [vmem:[%s1829_s5 + $0x8] sm:$0xff]  ;;  %v858_v19 = vld [vmem:[%s1829_s5 + $0x10] sm:$0xf] }
  0x52   : > { %869 = vperm.xlu2 %1349, %v860_v33   ;;  %v917_v33 = vld [vmem:[%s1830_s6 + $0x8] sm:$0xff] }
  0x55   : > { %864 = vperm.xlu0 %1347, %v859_v20   ;;  %934 = vperm.xlu1 %1348, %v921_v21  }
  0x5a   : > { %929 = vperm.xlu2 %1349, %v920_v44  }
  0x5d   : > { %924 = vperm.xlu0 %1347, %v919_v22   ;;  %996 = vperm.xlu1 %1348, %v983_v23  }
  0x62   : > { %991 = vperm.xlu2 %1349, %v982_v46  }
  0x65   : > { %986 = vperm.xlu0 %1347, %v981_v24   ;;  %1050 = vperm.xlu1 %1348, %v1044_v25  }
  0x6a   : > { %1055 = vperm.xlu2 %1349, %v1045_v48   ;;  %v979_v48 = vld [vmem:[%s1831_s7 + $0x8] sm:$0xff] }
  0x6d   : > { %1060 = vperm.xlu0 %1347, %v1046_v26   ;;  %1065 = vperm.xlu1 %1348, %v1047_v27  }
  0x94   : > { %v710_v51 = vpop.permute.xlu2 %709 }
  0x9c   : > { %v705_v57 = vpop.permute.xlu2 %704 }
  0xa4   : > { %v769_v8 = vpop.permute.xlu2 %768 }
  0xa7   : > { %v655_v31 = vpop.permute.xlu0 %654  ;;  %v645_v35 = vpop.permute.xlu1 %644 }
  0xac   : > { %v870_v23 = vpop.permute.xlu2 %869 }
  0xaf   : > { %v650_v36 = vpop.permute.xlu0 %649  ;;  %v715_v53 = vpop.permute.xlu1 %714 }
  0xb7   : > { %v779_v3 = vpop.permute.xlu0 %778  ;;  %v774_v4 = vpop.permute.xlu1 %773 }
  0xbc   : > { %v684_v34 = vpop.f32.mrf.mxu0 }
  0xbd   : > { %v685_v40 = vadd.f32 %v684_v34, %v645_v35  ;;  %v918_v34 = vld [vmem:[%s1830_s6 + $0x10] sm:$0xf] }
  0xbf   : > { %v693_v43 = vmax.f32 %v685_v40, 0.0  ;;  %v827_v14 = vpop.permute.xlu0 %826  ;;  %v875_v22 = vpop.permute.xlu1 %874 }
  0xc1   : > { %v687_v32 = vpop.f32.mrf.mxu3 }
  0xc2   : > { %v688_v38 = vadd.f32 %v687_v32, %v650_v36  ;;  %v916_v32 = vld [vmem:[%s1830_s6] sm:$0xff] }
  0xc4   : > { %v694_v42 = vmax.f32 %v688_v38, 0.0  ;;  %v930_v38 = vpop.permute.xlu2 %929 }
  0xc7   : > { %v865_v27 = vpop.permute.xlu0 %864 }
  0xc9   : > { %v690_v37 = vpop.f32.mrf.mxu3 }
  0xca   : > { %v691_v39 = vadd.f32 %v690_v37, %v655_v31  ;;  %v935_v37 = vpop.permute.xlu1 %934 }
  0xcc   : > { %v695_v41 = vmax.f32 %v691_v39, 0.0 }
  0xce   : > { %1263 = vmatpush.msk.msra.mxu1 %vm727_vm1, %v695_v41 }
  0xd0   : > { %745 = vmatpush.msra.mxu1 %v694_v42  ;;  %v925_v42 = vpop.permute.xlu0 %924 }
  0xd2   : > { %746 = vmatpush.msra.mxu1 %v693_v43 }
  0xd3   : > { %1264 = vmatmul.msk.f32.vlgmr.msra.gmra.mxu1 %vm717_vm2, %v696_v45 }
  0xdb   : > { %1265 = vmatmul.msk.f32.gmra.mxu1 %vm717_vm2, %v697_v47  ;;  %v978_v47 = vld [vmem:[%s1831_s7] sm:$0xff] }
  0xe3   : > { %1266 = vmatmul.msk.f32.gmra.mxu1 %vm717_vm2, %v698_v49  ;;  %v980_v49 = vld [vmem:[%s1831_s7 + $0x10] sm:$0xf] }
 0x150   : > { %v748_v50 = vpop.f32.mrf.mxu1 }
 0x151   : > { %v749_v58 = vadd.f32 %v748_v50, %v705_v57  ;;  %v987_v57 = vpop.permute.xlu0 %986 }
 0x153   : > { %v757_v61 = vmax.f32 %v749_v58, 0.0 }
 0x158   : > { %v751_v52 = vpop.f32.mrf.mxu1 }
 0x159   : > { %v752_v55 = vadd.f32 %v751_v52, %v710_v51  ;;  %v997_v52 = vpop.permute.xlu1 %996 }
 0x15b   : > { %v758_v60 = vmax.f32 %v752_v55, 0.0 }
 0x160   : > { %v754_v54 = vpop.f32.mrf.mxu1 }
 0x161   : > { %v755_v56 = vadd.f32 %v754_v54, %v715_v53  ;;  %v992_v53 = vpop.permute.xlu2 %991 }
 0x163   : > { %v759_v59 = vmax.f32 %v755_v56, 0.0 }
 0x165   : > { %1267 = vmatpush.msk.msra.mxu2 %vm727_vm1, %v759_v59 }
 0x167   : > { %807 = vmatpush.msra.mxu2 %v758_v60 }
 0x169   : > { %808 = vmatpush.msra.mxu2 %v757_v61 }
 0x16a   : > { %1268 = vmatmul.msk.f32.vlgmr.msra.gmra.mxu2 %vm717_vm2, %v760_v62  ;;  %v1040_v62 = vld [vmem:[%s1832_s8] sm:$0xff] }
 0x172   : > { %1269 = vmatmul.msk.f32.gmra.mxu2 %vm717_vm2, %v761_v63  ;;  %v1041_v63 = vld [vmem:[%s1832_s8 + $0x8] sm:$0xff] }
 0x17a   : > { %1270 = vmatmul.msk.f32.gmra.mxu2 %vm717_vm2, %v762_v0  ;;  %v1042_v0 = vld [vmem:[%s1832_s8 + $0x10] sm:$0xff] }
 0x1ed   : > { %v810_v1 = vpop.f32.mrf.mxu2 }
 0x1ee   : > { %v811_v9 = vadd.f32 %v810_v1, %v769_v8  ;;  %v1043_v1 = vld [vmem:[%s1832_s8 + $0x18] sm:$0xff] }
 0x1f0   : > { %v819_v12 = vmax.f32 %v811_v9, 0.0 }
 0x1f5   : > { %v813_v2 = vpop.f32.mrf.mxu2 }
 0x1f6   : > { %v814_v6 = vadd.f32 %v813_v2, %v774_v4 }
 0x1f8   : > { %v820_v11 = vmax.f32 %v814_v6, 0.0 }
 0x1fd   : > { %v816_v5 = vpop.f32.mrf.mxu2 }
 0x1fe   : > { %v817_v7 = vadd.f32 %v816_v5, %v779_v3 }
 0x200   : > { %v821_v10 = vmax.f32 %v817_v7, 0.0 }
 0x202   : > { %1271 = vmatpush.msk.msrb.mxu3 %vm727_vm1, %v821_v10 }
 0x204   : > { %849 = vmatpush.msrb.mxu3 %v820_v11 }
 0x206   : > { %850 = vmatpush.msrb.mxu3 %v819_v12 }
 0x207   : > { %1272 = vmatmul.msk.f32.vlgmr.msrb.gmra.mxu3 %vm717_vm2, %v822_v13 }
 0x28a   : > { %v852_v15 = vpop.f32.mrf.mxu3 }
 0x28b   : > { %v853_v16 = vadd.f32 %v852_v15, %v827_v14 }
 0x28d   : > { %855 = vst [vmem:[%s1718_s19] sm:$0xff] %v853_v16  ;;  %902 = vmatpush.msra.mxu3 %v853_v16 }
 0x28e   : > { %1273 = vmatmul.msk.f32.vlgmr.msra.gmra.mxu3 %vm877_vm3, %v856_v17 }
 0x296   : > { %1274 = vmatmul.msk.f32.gmra.mxu3 %vm877_vm3, %v857_v18 }
 0x29e   : > { %1275 = vmatmul.msk.f32.gmra.mxu3 %vm877_vm3, %v858_v19 }
 0x311   : > { %v904_v20 = vpop.f32.mrf.mxu3 }
 0x312   : > { %v905_v28 = vadd.f32 %v904_v20, %v865_v27 }
 0x314   : > { %v913_v31 = vmax.f32 %v905_v28, 0.0 }
 0x319   : > { %v907_v21 = vpop.f32.mrf.mxu3 }
 0x31a   : > { %v908_v25 = vadd.f32 %v907_v21, %v870_v23 }
 0x31c   : > { %v914_v30 = vmax.f32 %v908_v25, 0.0 }
 0x321   : > { %v910_v24 = vpop.f32.mrf.mxu3 }
 0x322   : > { %v911_v26 = vadd.f32 %v910_v24, %v875_v22 }
 0x324   : > { %v915_v29 = vmax.f32 %v911_v26, 0.0 }
 0x326   : > { %1276 = vmatpush.msk.msrb.mxu1 %vm727_vm1, %v915_v29 }
 0x328   : > { %963 = vmatpush.msrb.mxu1 %v914_v30 }
 0x32a   : > { %964 = vmatpush.msrb.mxu1 %v913_v31 }
 0x32b   : > { %1277 = vmatmul.msk.f32.vlgmr.msrb.gmra.mxu1 %vm717_vm2, %v916_v32 }
 0x333   : > { %1278 = vmatmul.msk.f32.gmra.mxu1 %vm717_vm2, %v917_v33 }
 0x33b   : > { %1279 = vmatmul.msk.f32.gmra.mxu1 %vm717_vm2, %v918_v34 }
 0x3a8   : > { %v966_v35 = vpop.f32.mrf.mxu1 }
 0x3a9   : > { %v967_v43 = vadd.f32 %v966_v35, %v925_v42 }
 0x3ab   : > { %v975_v46 = vmax.f32 %v967_v43, 0.0 }
 0x3b0   : > { %v969_v36 = vpop.f32.mrf.mxu1 }
 0x3b1   : > { %v970_v40 = vadd.f32 %v969_v36, %v930_v38 }
 0x3b3   : > { %v976_v45 = vmax.f32 %v970_v40, 0.0 }
 0x3b8   : > { %v972_v39 = vpop.f32.mrf.mxu1 }
 0x3b9   : > { %v973_v41 = vadd.f32 %v972_v39, %v935_v37 }
 0x3bb   : > { %v977_v44 = vmax.f32 %v973_v41, 0.0 }
 0x3bd   : > { %1280 = vmatpush.msk.msrb.mxu2 %vm727_vm1, %v977_v44 }
 0x3bf   : > { %1025 = vmatpush.msrb.mxu2 %v976_v45 }
 0x3c1   : > { %1026 = vmatpush.msrb.mxu2 %v975_v46 }
 0x3c2   : > { %1281 = vmatmul.msk.f32.vlgmr.msrb.gmra.mxu2 %vm717_vm2, %v978_v47 }
 0x3ca   : > { %1282 = vmatmul.msk.f32.gmra.mxu2 %vm717_vm2, %v979_v48 }
 0x3d2   : > { %1283 = vmatmul.msk.f32.gmra.mxu2 %vm717_vm2, %v980_v49 }
 0x445   : > { %v1028_v50 = vpop.f32.mrf.mxu2 }
 0x446   : > { %v1029_v58 = vadd.f32 %v1028_v50, %v987_v57 }
 0x448   : > { %v1037_v61 = vmax.f32 %v1029_v58, 0.0 }
 0x44d   : > { %v1031_v51 = vpop.f32.mrf.mxu2 }
 0x44e   : > { %v1032_v55 = vadd.f32 %v1031_v51, %v992_v53 }
 0x450   : > { %v1038_v60 = vmax.f32 %v1032_v55, 0.0 }
 0x455   : > { %v1034_v54 = vpop.f32.mrf.mxu2 }
 0x456   : > { %v1035_v56 = vadd.f32 %v1034_v54, %v997_v52 }
 0x458   : > { %v1039_v59 = vmax.f32 %v1035_v56, 0.0 }
 0x45a   : > { %1284 = vmatpush.msk.msrb.mxu0 %vm727_vm1, %v1039_v59 }
 0x45c   : > { %1097 = vmatpush.msrb.mxu0 %v1038_v60 }
 0x45e   : > { %1098 = vmatpush.msrb.mxu0 %v1037_v61 }
 0x45f   : > { %1285 = vmatmul.msk.f32.vlgmr.msrb.gmra.mxu0 %vm717_vm2, %v1040_v62 }
 0x467   : > { %1286 = vmatmul.msk.f32.gmra.mxu0 %vm717_vm2, %v1041_v63 }
 0x46f   : > { %1287 = vmatmul.msk.f32.gmra.mxu0 %vm717_vm2, %v1042_v0 }
 0x477   : > { %1288 = vmatmul.msk.f32.gmra.mxu0 %vm717_vm2, %v1043_v1 }
 0x478   : > { %1377 = shalt.err (!%p1374_p5)
}
 0x479   : > { %1299 = dma.vmem_to_hbm [thread:$0]  (%p1583_p6), %s1135_s1, 128, %s1137_s3, %s1117_s26   ;;  %v1051_v2 = vpop.permute.xlu1 %1050  ;;  %v1056_v5 = vpop.permute.xlu2 %1055 }
 0x47a   : > { %s1873_s19 = sshll.u32 %s1606_s22, 5  ;;  %v1061_v8 = vpop.permute.xlu0 %1060  ;;  %s1146_s23 = scalar_lea.hbm %s1842_s18, %s1771_s21 }
 0x47b   : > { %s631_s29 = scalar_lea.vmem [#allocation5], %s1873_s19  ;;  %s1149_s1 = sshll.u32 %s1146_s23, 4  ;;  %s1150_s1 = int_to_ptr.hbm [resolvable:$true] %s1149_s1 }
 0x47c   : > { %s1147_s3 = sshll.u32 %s631_s29, 4  ;;  %s1122_s26 = scalar_lea.sflag [#allocation6], %s1606_s22  ;;  %s1148_s3 = int_to_ptr.vmem [resolvable:$true] %s1147_s3 }
 0x47d   : > { %s1392_s25 = sshra.s32 %s1150_s1, 4  ;;  %s1398_s21 = scalar_lea.hbm %s1842_s18, 96  ;;  %s1393_s25 = int_to_ptr.hbm [resolvable:$true] %s1392_s25 }
 0x47e   : > { %s1394_s24 = scalar_lea.hbm %s1393_s25, 32  ;;  %p1399_p11 = scmp.lt.s32.totalorder %s1393_s25, %s1842_s18 }
 0x47f   : > { %p1395_p7 = scmp.ne.s32.totalorder %s1393_s25, %s1394_s24  ;;  %p1400_p12 = scmp.lt.s32.totalorder %s1398_s21, %s1394_s24 }
 0x481   : > { %v1066_v11 = vpop.permute.xlu1 %1065  ;;  %p1396_p9 = pnand %p1395_p7, %p1583_p6  ;;  %p1401_p13 = por %p1400_p12, %p1399_p11 }
 0x483   : > { %p1397_p10 = pneg %p1396_p9 }
 0x485   : > { %p1402_p0 = pnand %p1401_p13, %p1397_p10 }
 0x4dc   : > { %v1100_v3 = vpop.f32.mrf.mxu0 }
 0x4dd   : > { %v1101_v4 = vadd.f32 %v1100_v3, %v1051_v2 }
 0x4df   : > { %1112 = vst [vmem:[%s631_s29] sm:$0xff] %v1101_v4 }
 0x4e4   : > { %v1103_v6 = vpop.f32.mrf.mxu0 }
 0x4e5   : > { %v1104_v7 = vadd.f32 %v1103_v6, %v1056_v5 }
 0x4e7   : > { %1113 = vst [vmem:[%s631_s29 + $0x8] sm:$0xff] %v1104_v7 }
 0x4ec   : > { %v1106_v9 = vpop.f32.mrf.mxu0 }
 0x4ed   : > { %v1107_v10 = vadd.f32 %v1106_v9, %v1061_v8 }
 0x4ef   : > { %1114 = vst [vmem:[%s631_s29 + $0x10] sm:$0xff] %v1107_v10 }
 0x4f4   : > { %v1109_v12 = vpop.f32.mrf.mxu0 }
 0x4f5   : > { %v1110_v13 = vadd.f32 %v1109_v12, %v1066_v11 }
 0x4f7   : > { %1115 = vst [vmem:[%s631_s29 + $0x18] sm:$0xff] %v1110_v13 }
 0x4f8   : > { %1405 = shalt.err (!%p1402_p0)
}
 0x4f9   : > { %s1447_s22 = smov 128   ;;  %s1448_s29 = smov 384  }
 0x4fa   : > { %s1449_s28 = smov 8  }
 0x4fb   : > { %1300 = dma.vmem_to_hbm [thread:$0]  (%p1583_p6), %s1148_s3, 512, %s1150_s1, %s1122_s26, %s1447_s22, %s1448_s29, %s1449_s28  }
 0x4fc PF: > { %p1310_p1 = scmp.ge.s32.totalorder %s1444_s30, 2  ;;  %s1164_s0 = sand.u32 1, %s1432_s27  }
 0x4fd   : > { %s1165_s25 = scalar_lea.sflag [#allocation4], %s1164_s0 }
 0x4fe   : > { %p1304_p2 = pnand %p1310_p1, %p1587_p8 }
 0x500   : > { %p1305_p3 = pneg %p1304_p2 }
 0x502   : > { %1423 = dma.done.wait (%p1305_p3), %s1165_s25, 128  }
 0x503   : > { %1425 = vsyncadd (%p1305_p3), %s1165_s25, 4294967168  ;;  %s1175_s24 = scalar_lea.sflag [#allocation6], %s1164_s0 }
 0x504   : > { %1427 = dma.done.wait (%p1305_p3), %s1175_s24, 512  }
 0x505   : > { %1429 = vsyncadd (%p1305_p3), %s1175_s24, 4294966784  ;;  %s1875_s30 = sld [smem:[#allocation11_spill]] }
 0x506   : > { %s1876_s27 = sld [smem:[#allocation9_spill]] }
 0x507   : > { %s1877_s28 = sld [smem:[#allocation10_spill]] }
 0x508   : > { %s1878_s29 = sld [smem:[#allocation12_spill]] }
 0x50b   : > { %p32_p6 = scmp.ge.s32.totalorder %s1875_s30, 5  }
 0x50d   :  { %34 = sbr.rel (!%p32_p6) target bundleno = 11 (0xb), region = 183 }
 0x512   :  { %1181 = vsyncpa [#allocation4], 1 }
 0x513   :  { %1183 = vsyncpa [#allocation4 + $0x1], 1 }
 0x514   :  { %1184 = vsyncpa [#allocation6], 1 }
 0x515   :  { %1186 = vsyncpa [#allocation6 + $0x1], 1 }

</bundles_post_ra>
